<compile_context>
chip_gen: v5e
topology: v5e:2x2
jax: 0.10.0
libtpu: 0.0.40
codegen_flags: <defaults>
</compile_context>

<pallas_src>
import functools

import jax
import jax.numpy as jnp
from jax.experimental import pallas as pl
from jax.experimental.pallas import tpu as pltpu


def _round_up(x: int, m: int) -> int:
    return ((x + m - 1) // m) * m


def _two_hot_gather(idx_ref, tcat_ref, v):
    """logits[r, :] = table_hi[idx[r], :] + table_lo[idx[r], :] (== f32 table row).

    Single bf16 MXU matmul with K = 2V and f32 accumulation.
    """
    tm = idx_ref.shape[0]
    ids = idx_ref[...]                                              # (TM, 1) i32
    lane2 = jax.lax.broadcasted_iota(jnp.int32, (tm, 2 * v), 1)     # (TM, 2V)
    two_hot = jnp.logical_or(lane2 == ids, lane2 == ids + v)
    two_hot = two_hot.astype(jnp.bfloat16)                          # exact 0/1
    return jnp.dot(two_hot, tcat_ref[...],
                   preferred_element_type=jnp.float32)              # (TM, V)


def _bigram_infer_kernel(idx_ref, tcat_ref, logits_ref):
    # idx_ref: (TM, 1) i32 ; tcat_ref: (2V, V) bf16 ; logits_ref: (TM, V) f32
    v = logits_ref.shape[1]
    logits_ref[...] = _two_hot_gather(idx_ref, tcat_ref, v)


def _bigram_train_kernel(idx_ref, tgt_ref, tcat_ref, row_lse_ref,
                         logits_ref, loss_part_ref, *, n_valid):
    # idx_ref, tgt_ref: (TM, 1) i32 ; tcat_ref: (2V, V) bf16
    # row_lse_ref: (1, V) f32 ; logits_ref: (TM, V) f32
    # loss_part_ref: (1, 8, 128) f32 — one partial loss sum per grid block.
    tm = idx_ref.shape[0]
    v = logits_ref.shape[1]

    logits = _two_hot_gather(idx_ref, tcat_ref, v)                  # (TM, V) f32
    logits_ref[...] = logits

    # Cross entropy per row:
    #   loss_i = logsumexp(logits_i) - logits_i[target_i]
    # logits_i is exactly row idx_i of the table, so logsumexp(logits_i) is
    # row_lse[idx_i], selected with a one-hot (no exp/log per token).
    lane = jax.lax.broadcasted_iota(jnp.int32, (tm, v), 1)          # (TM, V)
    one_hot = (lane == idx_ref[...]).astype(jnp.float32)
    tgt_one_hot = (lane == tgt_ref[...]).astype(jnp.float32)
    per_row = jnp.sum(one_hot * row_lse_ref[...] - tgt_one_hot * logits,
                      axis=-1, keepdims=True)                       # (TM, 1)

    # Mask rows past the true N (ragged last block), then collapse to a single
    # per-block partial sum (lane-dense writeback, no masked strided stores).
    row0 = pl.program_id(0) * tm
    row_ids = row0 + jax.lax.broadcasted_iota(jnp.int32, (tm, 1), 0)
    masked = jnp.where(row_ids < n_valid, per_row, 0.0)             # (TM, 1)
    partial = jnp.sum(masked, axis=0, keepdims=True)                # (1, 1)
    loss_part_ref[...] = jnp.broadcast_to(partial.reshape(1, 1, 1), (1, 8, 128))


def bigram_forward(idx, table, targets=None, *, block_m=1024):
    """idx: (B, T) int, table: (V, V) float, targets: (B, T) int or None.

    block_m: row-tile size (multiple of 8). 1024 is a good default on all
    generations; sweep up to ~4096 before raising vmem_limit_bytes.
    """
    B, T = idx.shape
    V = table.shape[1]
    assert V % 128 == 0, "vocab size must be a multiple of 128 (lane-dense)"
    N = B * T

    tm = min(block_m, _round_up(N, 8))        # multiple of 8 (sublane tiling)
    grid_n = pl.cdiv(N, tm)                   # ragged last block handled by Pallas

    idx_flat = idx.reshape(N, 1).astype(jnp.int32)

    # Exact hi/lo bf16 split of the f32 table (hi + lo == table to ~2^-18 rel).
    # Stacked to (2V, V) so the two-hot gather is ONE bf16 matmul with K = 2V.
    table_f32 = table.astype(jnp.float32)
    table_hi = table_f32.astype(jnp.bfloat16)
    table_lo = (table_f32 - table_hi.astype(jnp.float32)).astype(jnp.bfloat16)
    table_cat = jnp.concatenate([table_hi, table_lo], axis=0)      # (2V, V) bf16

    idx_spec = pl.BlockSpec((tm, 1), lambda i: (i, 0))
    tcat_spec = pl.BlockSpec((2 * V, V), lambda i: (0, 0))         # VMEM-resident
    logits_spec = pl.BlockSpec((tm, V), lambda i: (i, 0))
    cparams = pltpu.CompilerParams(
        dimension_semantics=("parallel",),     # rows independent
        vmem_limit_bytes=32 * 1024 * 1024,
    )

    if targets is None:
        # Inference path: no cross-entropy work at all.
        logits = pl.pallas_call(
            _bigram_infer_kernel,
            grid=(grid_n,),
            in_specs=[idx_spec, tcat_spec],
            out_specs=logits_spec,
            out_shape=jax.ShapeDtypeStruct((N, V), jnp.float32),
            compiler_params=cparams,
        )(idx_flat, table_cat)
        return logits.reshape(B, T, V), None

    tgt_flat = targets.reshape(N, 1).astype(jnp.int32)

    # One-time O(V^2) pass: per-table-row logsumexp (only V distinct values),
    # reused by every token that hits that row.
    row_lse = jax.nn.logsumexp(table_f32, axis=-1, keepdims=True).T   # (1, V)

    kernel = functools.partial(_bigram_train_kernel, n_valid=N)
    logits, loss_part = pl.pallas_call(
        kernel,
        grid=(grid_n,),
        in_specs=[idx_spec,
                  idx_spec,                                        # targets: same tiling
                  tcat_spec,
                  pl.BlockSpec((1, V), lambda i: (0, 0))],         # row_lse, pinned
        out_specs=(logits_spec,
                   pl.BlockSpec((1, 8, 128), lambda i: (i, 0, 0))),
        out_shape=(jax.ShapeDtypeStruct((N, V), jnp.float32),
                   jax.ShapeDtypeStruct((grid_n, 8, 128), jnp.float32)),
        compiler_params=cparams,
    )(idx_flat, tgt_flat, table_cat, row_lse)

    loss = jnp.sum(loss_part[:, 0, 0]) / N                         # exact mean CE
    return logits, loss


def _reference_forward(idx, table, targets):
    """Pure-JAX reference matching the PyTorch module."""
    logits = table[idx]                       # (B, T, V)
    B, T, V = logits.shape
    logits = logits.reshape(B * T, V)
    tgt = targets.reshape(B * T)
    logp = jax.nn.log_softmax(logits, axis=-1)
    loss = -jnp.mean(logp[jnp.arange(B * T), tgt])
    return logits, loss


if __name__ == "__main__":
    vocab_size = 128   # V (lane-dense)
    B, T = 2, 8

    key = jax.random.PRNGKey(0)
    k_table, k_idx, k_tgt, k_idx2, k_tgt2 = jax.random.split(key, 5)

    # nn.Embedding default init: N(0, 1)
    table = jax.random.normal(k_table, (vocab_size, vocab_size), jnp.float32)
    idx = jax.random.randint(k_idx, (B, T), 0, vocab_size, jnp.int32)
    targets = jax.random.randint(k_tgt, (B, T), 0, vocab_size, jnp.int32)

    # Training path: (B*T, V) logits + scalar mean cross-entropy loss.
    logits, loss = bigram_forward(idx, table, targets)
    logits = jax.block_until_ready(logits)
    loss = jax.block_until_ready(loss)

    ref_logits, ref_loss = _reference_forward(idx, table, targets)
    assert logits.shape == (B * T, vocab_size)
    assert jnp.allclose(logits, ref_logits, atol=1e-5, rtol=1e-5)
    assert jnp.allclose(loss, ref_loss, atol=1e-5, rtol=1e-5)

    # Multi-block grid (parallel row axis, grid_n = 2).
    logits_mb, loss_mb = bigram_forward(idx, table, targets, block_m=8)
    logits_mb = jax.block_until_ready(logits_mb)
    assert jnp.allclose(logits_mb, ref_logits, atol=1e-5, rtol=1e-5)
    assert jnp.allclose(loss_mb, ref_loss, atol=1e-5, rtol=1e-5)

    # Ragged last block, no wrapper-side padding (N = 15, 16-row tile).
    B2, T2 = 3, 5
    idx2 = jax.random.randint(k_idx2, (B2, T2), 0, vocab_size, jnp.int32)
    tgt2 = jax.random.randint(k_tgt2, (B2, T2), 0, vocab_size, jnp.int32)
    logits2, loss2 = bigram_forward(idx2, table, tgt2)
    logits2 = jax.block_until_ready(logits2)
    ref_logits2, ref_loss2 = _reference_forward(idx2, table, tgt2)
    assert logits2.shape == (B2 * T2, vocab_size)
    assert jnp.allclose(logits2, ref_logits2, atol=1e-5, rtol=1e-5)
    assert jnp.allclose(loss2, ref_loss2, atol=1e-5, rtol=1e-5)

    # Ragged + multi-block (N = 15, 8-row tile -> 2 blocks, last one partial).
    logits3, loss3 = bigram_forward(idx2, table, tgt2, block_m=8)
    logits3 = jax.block_until_ready(logits3)
    assert jnp.allclose(logits3, ref_logits2, atol=1e-5, rtol=1e-5)
    assert jnp.allclose(loss3, ref_loss2, atol=1e-5, rtol=1e-5)

    # Inference path: (B, T, V) logits, loss=None, no CE work in the kernel.
    logits_inf, loss_inf = bigram_forward(idx, table, None)
    logits_inf = jax.block_until_ready(logits_inf)
    assert logits_inf.shape == (B, T, vocab_size)
    assert loss_inf is None
    assert jnp.allclose(logits_inf.reshape(B * T, vocab_size), ref_logits,
                        atol=1e-5, rtol=1e-5)

    # TODO(synk): generate() (multinomial sampling loop) is host-side control
    # flow, not a kernel hot path; omitted.
    print("KERNEL_OK")
</pallas_src>

<mosaic_0001>
module attributes {stable_mosaic.version = 11 : i64} {
  func.func @_bigram_train_kernel(%arg0: i32, %arg1: memref<16x1xi32, #tpu.memory_space<vmem>>, %arg2: memref<16x1xi32, #tpu.memory_space<vmem>>, %arg3: memref<256x128xbf16, #tpu.memory_space<vmem>>, %arg4: memref<1x128xf32, #tpu.memory_space<vmem>>, %arg5: memref<16x128xf32, #tpu.memory_space<vmem>>, %arg6: memref<1x8x128xf32, #tpu.memory_space<vmem>>) attributes {dimension_semantics = [#tpu.dimension_semantics<parallel>], iteration_bounds = array<i64: 1>, scalar_prefetch = 0 : i64, scratch_operands = 0 : i64, tpu.core_type = #tpu.core_type<tc>, window_params = [{transform_indices = @transform_0, window_bounds = array<i64: 16, 1>}, {transform_indices = @transform_1, window_bounds = array<i64: 16, 1>}, {pipeline_mode = #tpu.pipeline_mode<synchronous>, transform_indices = @transform_2, window_bounds = array<i64: 256, 128>}, {pipeline_mode = #tpu.pipeline_mode<synchronous>, transform_indices = @transform_3, window_bounds = array<i64: 1, 128>}, {transform_indices = @transform_4, window_bounds = array<i64: 16, 128>}, {transform_indices = @transform_5, window_bounds = array<i64: 1, 8, 128>}]} {
    %c0 = arith.constant 0 : index
    %c0_0 = arith.constant 0 : index
    %0 = vector.load %arg1[%c0, %c0_0] : memref<16x1xi32, #tpu.memory_space<vmem>>, vector<16x1xi32>
    %1 = tpu.iota {dimensions = array<i32: 1>} : vector<16x256xi32>
    %2 = vector.broadcast %0 : vector<16x1xi32> to vector<16x256xi32>
    %3 = arith.cmpi eq, %1, %2 : vector<16x256xi32>
    %c128_i32 = arith.constant 128 : i32
    %4 = vector.broadcast %c128_i32 : i32 to vector<16x1xi32>
    %5 = arith.addi %0, %4 : vector<16x1xi32>
    %6 = vector.broadcast %5 : vector<16x1xi32> to vector<16x256xi32>
    %7 = arith.cmpi eq, %1, %6 : vector<16x256xi32>
    %8 = arith.ori %3, %7 : vector<16x256xi1>
    %9 = arith.extui %8 : vector<16x256xi1> to vector<16x256xi32>
    %10 = arith.sitofp %9 : vector<16x256xi32> to vector<16x256xf32>
    %11 = arith.truncf %10 : vector<16x256xf32> to vector<16x256xbf16>
    %c0_1 = arith.constant 0 : index
    %c0_2 = arith.constant 0 : index
    %12 = vector.load %arg3[%c0_1, %c0_2] : memref<256x128xbf16, #tpu.memory_space<vmem>>, vector<256x128xbf16>
    %cst = arith.constant dense<0.000000e+00> : vector<16x128xf32>
    %13 = tpu.matmul %11, %12, %cst {dimension_numbers = #tpu.dot_dimension_numbers<[1], [0], [0], [1], [0, 0, 1, 1], [], []>} : vector<16x256xbf16>, vector<256x128xbf16>, vector<16x128xf32> -> vector<16x128xf32>
    %c0_3 = arith.constant 0 : index
    %c0_4 = arith.constant 0 : index
    %14 = vector.load %arg5[%c0_3, %c0_4] : memref<16x128xf32, #tpu.memory_space<vmem>>, vector<16x128xf32>
    tpu.vector_store %arg5[%c0_3, %c0_4], %13 {strides = array<i32>} : memref<16x128xf32, #tpu.memory_space<vmem>>, vector<16x128xf32>,
    %15 = tpu.iota {dimensions = array<i32: 1>} : vector<16x128xi32>
    %c0_5 = arith.constant 0 : index
    %c0_6 = arith.constant 0 : index
    %16 = vector.load %arg1[%c0_5, %c0_6] : memref<16x1xi32, #tpu.memory_space<vmem>>, vector<16x1xi32>
    %17 = vector.broadcast %16 : vector<16x1xi32> to vector<16x128xi32>
    %18 = arith.cmpi eq, %15, %17 : vector<16x128xi32>
    %19 = arith.extui %18 : vector<16x128xi1> to vector<16x128xi32>
    %20 = arith.sitofp %19 : vector<16x128xi32> to vector<16x128xf32>
    %c0_7 = arith.constant 0 : index
    %c0_8 = arith.constant 0 : index
    %21 = vector.load %arg2[%c0_7, %c0_8] : memref<16x1xi32, #tpu.memory_space<vmem>>, vector<16x1xi32>
    %22 = vector.broadcast %21 : vector<16x1xi32> to vector<16x128xi32>
    %23 = arith.cmpi eq, %15, %22 : vector<16x128xi32>
    %24 = arith.extui %23 : vector<16x128xi1> to vector<16x128xi32>
    %25 = arith.sitofp %24 : vector<16x128xi32> to vector<16x128xf32>
    %c0_9 = arith.constant 0 : index
    %c0_10 = arith.constant 0 : index
    %26 = vector.load %arg4[%c0_9, %c0_10] : memref<1x128xf32, #tpu.memory_space<vmem>>, vector<1x128xf32>
    %27 = vector.broadcast %26 : vector<1x128xf32> to vector<16x128xf32>
    %28 = arith.mulf %20, %27 : vector<16x128xf32>
    %29 = arith.mulf %25, %13 : vector<16x128xf32>
    %30 = arith.subf %28, %29 : vector<16x128xf32>
    %cst_11 = arith.constant dense<0.000000e+00> : vector<16xf32>
    %31 = vector.multi_reduction <add>, %30, %cst_11 [1] : vector<16x128xf32> to vector<16xf32>
    %32 = vector.shape_cast %31 : vector<16xf32> to vector<16x1xf32>
    %c16_i32 = arith.constant 16 : i32
    %33 = arith.muli %arg0, %c16_i32 : i32
    %34 = tpu.iota {dimensions = array<i32: 0>} : vector<16x1xi32>
    %35 = vector.broadcast %33 : i32 to vector<16x1xi32>
    %36 = arith.addi %35, %34 : vector<16x1xi32>
    %c16_i32_12 = arith.constant 16 : i32
    %37 = vector.broadcast %c16_i32_12 : i32 to vector<16x1xi32>
    %38 = arith.cmpi slt, %36, %37 : vector<16x1xi32>
    %cst_13 = arith.constant 0.000000e+00 : f32
    %39 = vector.broadcast %cst_13 : f32 to vector<16x1xf32>
    %40 = arith.select %38, %32, %39 : vector<16x1xi1>, vector<16x1xf32>
    %cst_14 = arith.constant dense<0.000000e+00> : vector<1xf32>
    %41 = vector.multi_reduction <add>, %40, %cst_14 [0] : vector<16x1xf32> to vector<1xf32>
    %42 = vector.shape_cast %41 : vector<1xf32> to vector<1x1xf32>
    %43 = vector.shape_cast %42 : vector<1x1xf32> to vector<1x1x1xf32>
    %44 = vector.shape_cast %43 : vector<1x1x1xf32> to vector<1x1x1xf32>
    %45 = vector.broadcast %44 : vector<1x1x1xf32> to vector<1x8x128xf32>
    %c0_15 = arith.constant 0 : index
    %c0_16 = arith.constant 0 : index
    %c0_17 = arith.constant 0 : index
    %46 = vector.load %arg6[%c0_15, %c0_16, %c0_17] : memref<1x8x128xf32, #tpu.memory_space<vmem>>, vector<1x8x128xf32>
    tpu.vector_store %arg6[%c0_15, %c0_16, %c0_17], %45 {strides = array<i32>} : memref<1x8x128xf32, #tpu.memory_space<vmem>>, vector<1x8x128xf32>,
    return
  }
  func.func @transform_0(%arg0: i32) -> (i32, i32) {
    %c0_i32 = arith.constant 0 : i32
    %c0_i32_0 = arith.constant 0 : i32
    return %arg0, %c0_i32 : i32, i32
  }
  func.func @transform_1(%arg0: i32) -> (i32, i32) {
    %c0_i32 = arith.constant 0 : i32
    %c0_i32_0 = arith.constant 0 : i32
    return %arg0, %c0_i32 : i32, i32
  }
  func.func @transform_2(%arg0: i32) -> (i32, i32) {
    %c0_i32 = arith.constant 0 : i32
    %c0_i32_0 = arith.constant 0 : i32
    %c0_i32_1 = arith.constant 0 : i32
    return %c0_i32, %c0_i32_0 : i32, i32
  }
  func.func @transform_3(%arg0: i32) -> (i32, i32) {
    %c0_i32 = arith.constant 0 : i32
    %c0_i32_0 = arith.constant 0 : i32
    %c0_i32_1 = arith.constant 0 : i32
    return %c0_i32, %c0_i32_0 : i32, i32
  }
  func.func @transform_4(%arg0: i32) -> (i32, i32) {
    %c0_i32 = arith.constant 0 : i32
    %c0_i32_0 = arith.constant 0 : i32
    return %arg0, %c0_i32 : i32, i32
  }
  func.func @transform_5(%arg0: i32) -> (i32, i32, i32) {
    %c0_i32 = arith.constant 0 : i32
    %c0_i32_0 = arith.constant 0 : i32
    %c0_i32_1 = arith.constant 0 : i32
    return %arg0, %c0_i32, %c0_i32_0 : i32, i32, i32
  }
}

</mosaic_0001>

<bundles_post_ra>
// kernel: tpu_custom_call.1
= control target key start
LH: loop header
LB: loop body
LE: loop exit
PB: predicated region body
PF: predicated region fallthrough
CT: control target
= control target key end

     0   :  { %11 = vsyncpa [#allocation3], 0  ;;  %s580_s0 = inlined_call_operand.vmem [shape: s32[16,1], index: 0, kind: input, shape index: {}]   ;;  %s581_s1 = inlined_call_operand.vmem [shape: s32[16,1], index: 1, kind: input, shape index: {}]   ;;  %s582_s2 = inlined_call_operand.hbm [shape: bf16[256,128], index: 2, kind: input, shape index: {}]   ;;  %s583_s3 = inlined_call_operand.vmem [shape: f32[1,128], index: 3, kind: input, shape index: {}]   ;;  %s584_s4 = inlined_call_operand.hbm [shape: f32[16,128], index: 4, kind: output, shape index: {0}]   ;;  %s585_s5 = inlined_call_operand.hbm [shape: f32[1,8,128], index: 5, kind: output, shape index: {1}]  }
   0x1   :  { %12 = vsyncpa [#allocation4], 0 }
   0x2   :  { %13 = vsyncpa [#allocation7], 0  ;;  %s22_s20 = sshll.u32 %s582_s2, 4  ;;  %s516_s21 = smov [#allocation2]   ;;  %s23_s20 = int_to_ptr.hbm [resolvable:$true] %s22_s20 }
   0x3   :  { %s24_s22 = sshll.u32 %s516_s21, 4  ;;  %s517_s23 = smov 64   ;;  %s25_s22 = int_to_ptr.vmem [resolvable:$true] %s24_s22 }
   0x4   :  { %s518_s24 = smov 4  }
   0x5   :  { %30 = dma.hbm_to_vmem [thread:$0]  %s23_s20, 2048, %s25_s22, [#allocation3], %s517_s23, %s517_s23, %s518_s24  }
   0x6   :  { %510 = dma.done.wait [#allocation3], 2048  }
   0x7   :  { %511 = vsyncadd [#allocation3], 4294965248  ;;  %v519_v0 = vmov 0   ;;  %v37_v1 = vld [vmem:[%s580_s0] sm:$0xff]  ;;  %v415_v3 = vld [vmem:[#allocation2 + $0x38] sm:$0xff]  ;;  %v39_v23 = vlaneseq  ;;  %v521_v34 = vmov 0.0  }
   0x8   :  { %434 = vset.pattern.permute.xlu0 %v519_v0  ;;  %435 = vset.pattern.permute.xlu1 %v519_v0  ;;  %v52_v2 = vadd.s32 128, %v37_v1  ;;  %v423_v4 = vld [vmem:[#allocation2 + $0x78] sm:$0xff]  ;;  %v414_v5 = vld [vmem:[#allocation2 + $0x30] sm:$0xff]  ;;  %v38_v6 = vld [vmem:[%s580_s0 + $0x8] sm:$0xff]  ;;  %v520_v30 = vmov 1.0|1.0  }
   0x9   :  { %436 = vset.pattern.permute.xlu2 %v519_v0  ;;  %43 = vperm.xlu0 %434, %v37_v1   ;;  %v422_v7 = vld [vmem:[#allocation2 + $0x70] sm:$0xff]  ;;  %v53_v8 = vadd.s32 128, %v38_v6  ;;  %v413_v9 = vld [vmem:[#allocation2 + $0x28] sm:$0xff]  ;;  %v412_v11 = vld [vmem:[#allocation2 + $0x20] sm:$0xff]  ;;  %v40_v24 = vand.u32 127, %v39_v23  ;;  %s303_s8 = sshll.u32 %s584_s4, 4  ;;  %s304_s8 = int_to_ptr.hbm [resolvable:$true] %s303_s8 }
   0xa   :  { %239 = vperm.xlu2 %436, %v37_v1   ;;  %55 = vperm.xlu1 %435, %v52_v2   ;;  %v421_v10 = vld [vmem:[#allocation2 + $0x68] sm:$0xff]  ;;  %v420_v12 = vld [vmem:[#allocation2 + $0x60] sm:$0xff]  ;;  %v411_v14 = vld [vmem:[#allocation2 + $0x18] sm:$0xff]  ;;  %s522_s9 = smov [#allocation5]   ;;  %s523_s11 = smov 128  }
   0xb   :  { %206 = vmatpush.bf16.msra.mxu0 %v415_v3  ;;  %220 = vmatpush.bf16.msra.mxu1 %v423_v4  ;;  %v250_v13 = vld [vmem:[%s581_s1] sm:$0xff]  ;;  %v251_v15 = vld [vmem:[%s581_s1 + $0x8] sm:$0xff]  ;;  %v419_v16 = vld [vmem:[#allocation2 + $0x58] sm:$0xff]  ;;  %v41_v27 = vadd.s32 128, %v40_v24  ;;  %s301_s10 = sshll.u32 %s522_s9, 4  ;;  %s524_s12 = smov 8   ;;  %s302_s10 = int_to_ptr.vmem [resolvable:$true] %s301_s10 }
   0xc   :  { %v410_v17 = vld [vmem:[#allocation2 + $0x10] sm:$0xff]  ;;  %v409_v19 = vld [vmem:[#allocation2 + $0x8] sm:$0xff]  ;;  %v408_v21 = vld [vmem:[#allocation2] sm:$0xff]  ;;  %s525_s13 = smov [#allocation6]   ;;  %s317_s4 = sshll.u32 %s585_s5, 4  ;;  %s318_s4 = int_to_ptr.hbm [resolvable:$true] %s317_s4 }
   0xd   :  { %v418_v18 = vld [vmem:[#allocation2 + $0x50] sm:$0xff]  ;;  %v417_v20 = vld [vmem:[#allocation2 + $0x48] sm:$0xff]  ;;  %v416_v22 = vld [vmem:[#allocation2 + $0x40] sm:$0xff]  ;;  %s315_s14 = sshll.u32 %s525_s13, 4  ;;  %s316_s14 = int_to_ptr.vmem [resolvable:$true] %s315_s14 }
   0xe   :  { %v437_v33 = vld [vmem:[%s583_s3] ss:$0 sm:$0xff] }
   0xf   :  { %207 = vmatpush.bf16.msra.mxu0 %v414_v5  ;;  %221 = vmatpush.bf16.msra.mxu1 %v422_v7 }
  0x11   :  { %46 = vperm.xlu0 %434, %v38_v6  }
  0x12   :  { %242 = vperm.xlu2 %436, %v38_v6   ;;  %58 = vperm.xlu1 %435, %v53_v8  }
  0x13   :  { %208 = vmatpush.bf16.msra.mxu0 %v413_v9  ;;  %222 = vmatpush.bf16.msra.mxu1 %v421_v10 }
  0x17   :  { %209 = vmatpush.bf16.msra.mxu0 %v412_v11  ;;  %223 = vmatpush.bf16.msra.mxu1 %v420_v12 }
  0x19   :  { %253 = vperm.xlu0 %434, %v250_v13  }
  0x1a   :  { %256 = vperm.xlu1 %435, %v251_v15  }
  0x1b   :  { %210 = vmatpush.bf16.msra.mxu0 %v411_v14  ;;  %224 = vmatpush.bf16.msra.mxu1 %v419_v16 }
  0x1f   :  { %211 = vmatpush.bf16.msra.mxu0 %v410_v17  ;;  %225 = vmatpush.bf16.msra.mxu1 %v418_v18 }
  0x23   :  { %212 = vmatpush.bf16.msra.mxu0 %v409_v19  ;;  %226 = vmatpush.bf16.msra.mxu1 %v417_v20 }
  0x27   :  { %213 = vmatpush.bf16.msra.mxu0 %v408_v21  ;;  %227 = vmatpush.bf16.msra.mxu1 %v416_v22 }
  0x64   :  { %v240_v31 = vpop.permute.xlu2 %239 }
  0x65   :  { %vm244_vm14 = vcmp.eq.s32.totalorder %v40_v24, %v240_v31 }
  0x66   :  { %v404_v35 = vsel %vm244_vm14, 1.0, %v521_v34 }
  0x67   :  { %v268_v38 = vmul.f32 %v437_v33, %v404_v35 }
  0x6c   :  { %v243_v41 = vpop.permute.xlu2 %242 }
  0x7b   :  { %v44_v25 = vpop.permute.xlu0 %43 }
  0x7c   :  { %v56_v26 = vpop.permute.xlu1 %55  ;;  %vm48_vm0 = vcmp.eq.s32.totalorder %v40_v24, %v44_v25  ;;  %vm49_vm2 = vcmp.eq.s32.totalorder %v41_v27, %v44_v25 }
  0x7d   :  { %vm60_vm1 = vcmp.eq.s32.totalorder %v40_v24, %v56_v26  ;;  %vm61_vm3 = vcmp.eq.s32.totalorder %v41_v27, %v56_v26 }
  0x7e   :  { %vm64_vm4 = vmor %vm48_vm0, %vm60_vm1  ;;  %vm245_vm0 = vcmp.eq.s32.totalorder %v40_v24, %v243_v41 }
  0x7f   :  { %vm65_vm8 = vmor %vm49_vm2, %vm61_vm3  ;;  %v405_v46 = vsel %vm245_vm0, 1.0, %v521_v34 }
  0x80   :  { %v269_v50 = vmul.f32 %v437_v33, %v405_v46 }
  0x83   :  { %v47_v28 = vpop.permute.xlu0 %46 }
  0x84   :  { %v59_v29 = vpop.permute.xlu1 %58  ;;  %vm50_vm5 = vcmp.eq.s32.totalorder %v40_v24, %v47_v28  ;;  %vm51_vm10 = vcmp.eq.s32.totalorder %v41_v27, %v47_v28 }
  0x85   :  { %vm62_vm6 = vcmp.eq.s32.totalorder %v40_v24, %v59_v29  ;;  %vm63_vm7 = vcmp.eq.s32.totalorder %v41_v27, %v59_v29 }
  0x86   :  { %vm66_vm9 = vmor %vm50_vm5, %vm62_vm6 }
  0x87   :  { %vm400_vm11 = vmpackc.low %vm66_vm9, %vm64_vm4 }
  0x88   :  { %401 = vmatmul.msk.bf16.vlgmr.msra.gmra.mxu0 %vm400_vm11, %v520_v30  ;;  %vm67_vm12 = vmor %vm51_vm10, %vm63_vm7 }
  0x89   :  { %vm402_vm13 = vmpackc.low %vm67_vm12, %vm65_vm8 }
  0x8a   :  { %403 = vmatmul.msk.bf16.vlgmr.msra.gmra.mxu1 %vm402_vm13, %v520_v30 }
  0x8b   :  { %v254_v32 = vpop.permute.xlu0 %253 }
  0x8c   :  { %vm258_vm15 = vcmp.eq.s32.totalorder %v40_v24, %v254_v32  ;;  %v257_v43 = vpop.permute.xlu1 %256 }
  0x8d   :  { %v406_v40 = vsel %vm258_vm15, 1.0, %v521_v34  ;;  %vm259_vm1 = vcmp.eq.s32.totalorder %v40_v24, %v257_v43 }
  0x8e   :  { %v407_v49 = vsel %vm259_vm1, 1.0, %v521_v34 }
 0x105   :  { %v215_v36 = vpop.f32.mrf.mxu0 }
 0x107   :  { %v229_v37 = vpop.f32.mrf.mxu1 }
 0x108   :  { %v230_v39 = vadd.f32 %v229_v37, %v215_v36 }
 0x10a   :  { %234 = vst [vmem:[#allocation5] sm:$0xff] %v230_v39  ;;  %v270_v42 = vmul.f32 %v406_v40, %v230_v39 }
 0x10c   :  { %v272_v44 = vsub.f32 %v268_v38, %v270_v42 }
 0x10d   :  { %v217_v45 = vpop.f32.mrf.mxu0 }
 0x10e   :  { %274 = vadd.xlane.f32.xlu2 %v272_v44 }
 0x10f   :  { %v231_v47 = vpop.f32.mrf.mxu1 }
 0x110   :  { %v232_v48 = vadd.f32 %v231_v47, %v217_v45 }
 0x112   :  { %235 = vst [vmem:[#allocation5 + $0x8] sm:$0xff] %v232_v48  ;;  %v271_v51 = vmul.f32 %v407_v49, %v232_v48 }
 0x113   :  { %309 = dma.vmem_to_hbm [thread:$0]  %s302_s10, 256, %s304_s8, [#allocation4], %s523_s11, %s523_s11, %s524_s12  }
 0x114   :  { %v273_v52 = vsub.f32 %v269_v50, %v271_v51 }
 0x116   :  { %276 = vadd.xlane.f32.xlu0 %v273_v52 }
 0x181   :  { %v275_v53 = vpop.xlane.xlu2 %274 }
 0x189   :  { %v277_v54 = vpop.xlane.xlu0 %276 }
 0x18a   :  { %v289_v55 = vadd.f32 %v277_v54, %v275_v53 }
 0x18c   :  { %v290_v56 = vrot.slane %v289_v55, 4 }
 0x18e   :  { %v291_v57 = vadd.f32 %v290_v56, %v289_v55 }
 0x190   :  { %v292_v58 = vrot.slane %v291_v57, 2 }
 0x192   :  { %v293_v59 = vadd.f32 %v292_v58, %v291_v57 }
 0x194   :  { %v294_v60 = vrot.slane %v293_v59, 1 }
 0x196   :  { %v295_v61 = vadd.f32 %v294_v60, %v293_v59 }
 0x198   :  { %296 = vst [vmem:[#allocation6] sm:$0xff] %v295_v61 }
 0x199   :  { %320 = dma.vmem_to_hbm [thread:$0]  %s316_s14, 128, %s318_s4, [#allocation7]  }
 0x19a   :  { %512 = dma.done.wait [#allocation4], 256  }
 0x19b   :  { %513 = vsyncadd [#allocation4], 4294967040 }
 0x19c   :  { %514 = dma.done.wait [#allocation7], 128  }
 0x19d   :  { %515 = vsyncadd [#allocation7], 4294967168 }
 0x19e   :  { %329 = vsyncpa [#allocation3], 1 }
 0x19f   :  { %330 = vsyncpa [#allocation4], 1 }
 0x1a0   :  { %331 = vsyncpa [#allocation7], 1 }

</bundles_post_ra>
